<compile_context>
chip_gen: v5e
topology: v5e:2x2
jax: 0.10.0
libtpu: 0.0.40
codegen_flags: <defaults>
</compile_context>

<pallas_src>
import jax
import jax.numpy as jnp
from jax import lax
from jax.experimental import pallas as pl
from jax.experimental.pallas import tpu as pltpu


# ----------------------------------------------------------------------------
# Tunables
# ----------------------------------------------------------------------------
_DMA_DEPTH = 4                        # max HBM->HBM DMAs in flight
_DMA_CHUNK_BYTES = 4 * 1024 * 1024    # per-DMA descriptor target (~4 MiB)
_COPY_GATE_BYTES = 4 * 1024 * 1024    # below this, metadata-only reshape
_MAX_LANES = 8192                     # widest lane-dense slab we form


# ----------------------------------------------------------------------------
# Chunked HBM -> HBM DMA copy (no VMEM staging, no grid)
# ----------------------------------------------------------------------------
def _dma_copy_2d(x2d, chunk_rows):
    """Identity-copy a 2-D slab HBM->HBM with pipelined chunked DMAs."""
    rows, cols = x2d.shape
    itemsize = jnp.dtype(x2d.dtype).itemsize
    n_full = rows // chunk_rows
    tail = rows - n_full * chunk_rows
    depth = min(_DMA_DEPTH, max(n_full, 1))

    def kernel(x_hbm, o_hbm, sems):
        def chunk_copy(i, slot):
            start = pl.multiple_of(i * chunk_rows, chunk_rows)
            return pltpu.make_async_copy(
                x_hbm.at[pl.ds(start, chunk_rows)],
                o_hbm.at[pl.ds(start, chunk_rows)],
                sems.at[slot],
            )

        if n_full > 0:
            # Prologue: put up to `depth` long DMAs in flight.
            for j in range(min(depth, n_full)):        # static unroll (<= 4)
                chunk_copy(j, j).start()

            # Steady state: wait chunk i, reuse its slot for chunk i + depth.
            def body(i, carry):
                chunk_copy(i, i % depth).wait()
                nxt = i + depth

                @pl.when(nxt < n_full)
                def _():
                    chunk_copy(nxt, nxt % depth).start()

                return carry

            lax.fori_loop(0, n_full, body, 0)

        if tail:
            # Static-size ragged tail, issued after all full chunks drained.
            t0 = n_full * chunk_rows
            cp = pltpu.make_async_copy(
                x_hbm.at[pl.ds(t0, tail)],
                o_hbm.at[pl.ds(t0, tail)],
                sems.at[0],
            )
            cp.start()
            cp.wait()

    return pl.pallas_call(
        kernel,
        out_shape=jax.ShapeDtypeStruct((rows, cols), x2d.dtype),
        in_specs=[pl.BlockSpec(memory_space=pl.ANY)],
        out_specs=pl.BlockSpec(memory_space=pl.ANY),
        scratch_shapes=[pltpu.SemaphoreType.DMA((depth,))],
        cost_estimate=pl.CostEstimate(
            flops=0,
            transcendentals=0,
            bytes_accessed=2 * rows * cols * itemsize,
        ),
    )(x2d)


# ----------------------------------------------------------------------------
# Slab / chunk sizing
# ----------------------------------------------------------------------------
def _choose_slab(total, itemsize):
    """Return (rows, cols, chunk_rows).  Requires total % 128 == 0."""
    # Widest multiple-of-128 divisor of `total`, capped at _MAX_LANES lanes.
    cols = 128
    k = _MAX_LANES // 128
    while k >= 1:
        c = 128 * k
        if total % c == 0:
            cols = c
            break
        k -= 1
    rows = total // cols

    # ~4 MiB contiguous DMA descriptors, rounded to a sublane-multiple of 8.
    chunk_rows = max(1, _DMA_CHUNK_BYTES // (cols * itemsize))
    if rows >= 8:
        chunk_rows = max(8, (min(chunk_rows, rows) // 8) * 8)
    else:
        chunk_rows = rows
    return rows, cols, chunk_rows


# ----------------------------------------------------------------------------
# aten.view.default
# ----------------------------------------------------------------------------
def aten_view(x, target_shape, *, copy=None):
    """Semantics of torch.ops.aten.view.default(x, target_shape).

    Row-major (contiguous) element order, identical to PyTorch's view on a
    contiguous tensor.

    copy=None  (auto): metadata-only reshape for small inputs, Pallas
                       HBM->HBM DMA copy for inputs >= _COPY_GATE_BYTES.
    copy=True        : force the Pallas copy (when the shape/dtype allows).
    copy=False       : force the metadata-only reshape.
    """
    total = 1
    for d in x.shape:
        total *= d

    # Resolve -1 in target_shape with torch-style validation.
    tgt = list(target_shape)
    if tgt.count(-1) > 1:
        raise ValueError("only one dimension can be inferred (-1)")
    if -1 in tgt:
        known = 1
        for d in tgt:
            if d != -1:
                known *= d
        if known == 0 or total % known != 0:
            raise ValueError(
                f"shape {tuple(target_shape)} is invalid for input of size {total}")
        tgt[tgt.index(-1)] = total // known
    else:
        prod = 1
        for d in tgt:
            prod *= d
        if prod != total:
            raise ValueError(
                f"shape {tuple(target_shape)} is invalid for input of size {total}")
    tgt = tuple(tgt)

    if total == 0:
        return jnp.reshape(x, tgt)

    itemsize = jnp.dtype(x.dtype).itemsize
    dtype_name = jnp.dtype(x.dtype).name

    if copy is None:
        use_kernel = total * itemsize >= _COPY_GATE_BYTES
    else:
        use_kernel = bool(copy)

    # The kernel path needs a lane-dense slab and a byte-addressable dtype;
    # everything else is served (correctly and optimally) by the
    # metadata-only reshape.
    if (not use_kernel
            or total % 128 != 0
            or itemsize not in (1, 2, 4)
            or "4" in dtype_name.replace("float32", "").replace("int32", "")
                                 .replace("uint32", "")):
        return jnp.reshape(x, tgt)

    rows, cols, chunk_rows = _choose_slab(total, itemsize)
    x2d = jnp.reshape(x, (rows, cols))       # metadata-only in XLA
    y2d = _dma_copy_2d(x2d, chunk_rows)      # Pallas HBM->HBM streaming copy
    return jnp.reshape(y2d, tgt)             # metadata-only in XLA


# ----------------------------------------------------------------------------
# Self-test
# ----------------------------------------------------------------------------
if __name__ == "__main__":
    key = jax.random.PRNGKey(0)

    # 1) swin_v2_b-flavored view (collapse spatial dims), forcing the Pallas
    #    DMA path so the kernel compiles and runs on TPU at a small shape.
    x = jax.random.normal(key, (2, 4, 16, 16), dtype=jnp.float32)
    target_shape = (2, 4, 256)
    out = jax.block_until_ready(aten_view(x, target_shape, copy=True))
    ref = x.reshape(target_shape)
    assert out.shape == ref.shape, (out.shape, ref.shape)
    assert out.dtype == ref.dtype
    assert bool(jnp.all(out == ref))

    # 2) -1 inference path, still through the Pallas copy.
    out2 = jax.block_until_ready(aten_view(x, (-1, 256), copy=True))
    ref2 = x.reshape(-1, 256)
    assert out2.shape == ref2.shape
    assert bool(jnp.all(out2 == ref2))

    # 3) Medium input (8 MiB): "auto" mode takes the kernel path and
    #    exercises the multi-chunk pipelined DMA loop (2 chunks in flight).
    xm = jax.random.normal(jax.random.PRNGKey(2), (2, 4, 256, 1024),
                           dtype=jnp.float32)
    out3 = jax.block_until_ready(aten_view(xm, (8, 256 * 1024)))
    assert bool(jnp.all(out3 == xm.reshape(8, 256 * 1024)))

    # 4) Small / non-multiple-of-128: metadata-only fast path (no kernel).
    y = jax.random.normal(jax.random.PRNGKey(1), (2, 3, 5), dtype=jnp.float32)
    out4 = jax.block_until_ready(aten_view(y, (6, 5)))
    assert bool(jnp.all(out4 == y.reshape(6, 5)))

    print("KERNEL_OK")
</pallas_src>

<mosaic_0001>
module attributes {stable_mosaic.version = 11 : i64} {
  func.func @kernel(%arg0: memref<1x2048xf32, #tpu.memory_space<any>>, %arg1: memref<1x2048xf32, #tpu.memory_space<any>>, %arg2: memref<1x!tpu.dma_semaphore, #tpu.memory_space<semaphore_mem>>) attributes {dimension_semantics = [], scalar_prefetch = 0 : i64, scratch_operands = 1 : i64, tpu.core_type = #tpu.core_type<tc>} {
    %c0_i32 = arith.constant 0 : i32
    %0 = tpu.assume_multiple %c0_i32, 1 : i32
    %c0_i32_0 = arith.constant 0 : i32
    %c0_i32_1 = arith.constant 0 : i32
    %1 = tpu.memref_slice %arg0[%0, %c0_i32_1] : memref<1x2048xf32, #tpu.memory_space<any>> -> memref<1x2048xf32, #tpu.memory_space<any>>
    %c0_i32_2 = arith.constant 0 : i32
    %2 = tpu.memref_slice %arg1[%0, %c0_i32_2] : memref<1x2048xf32, #tpu.memory_space<any>> -> memref<1x2048xf32, #tpu.memory_space<any>>
    %3 = tpu.memref_slice %arg2[%c0_i32_0] : memref<1x!tpu.dma_semaphore, #tpu.memory_space<semaphore_mem>> -> memref<1x!tpu.dma_semaphore, #tpu.memory_space<semaphore_mem>>
    %4 = tpu.memref_squeeze %3 : memref<1x!tpu.dma_semaphore, #tpu.memory_space<semaphore_mem>> -> memref<!tpu.dma_semaphore, #tpu.memory_space<semaphore_mem>>
    tpu.enqueue_dma source(%1 : memref<1x2048xf32, #tpu.memory_space<any>>) target(%2 : memref<1x2048xf32, #tpu.memory_space<any>>) target_semaphore(%4 : memref<!tpu.dma_semaphore, #tpu.memory_space<semaphore_mem>>)
    %c0_i32_3 = arith.constant 0 : i32
    %c1_i32 = arith.constant 1 : i32
    %c0_i32_4 = arith.constant 0 : i32
    %5 = arith.cmpi eq, %c1_i32, %c0_i32_4 : i32
    %c1_i32_5 = arith.constant 1 : i32
    %6 = arith.select %5, %c1_i32_5, %c1_i32 : i32
    %7 = arith.remsi %c0_i32_3, %6 : i32
    %c0_i32_6 = arith.constant 0 : i32
    %8 = arith.cmpi ne, %7, %c0_i32_6 : i32
    %c0_i32_7 = arith.constant 0 : i32
    %9 = arith.cmpi slt, %7, %c0_i32_7 : i32
    %c0_i32_8 = arith.constant 0 : i32
    %10 = arith.cmpi slt, %6, %c0_i32_8 : i32
    %11 = arith.xori %9, %10 : i1
    %12 = arith.andi %11, %8 : i1
    %13 = arith.addi %7, %6 : i32
    %14 = arith.select %12, %13, %7 : i32
    %c1_i32_9 = arith.constant 1 : i32
    %15 = arith.muli %c0_i32_3, %c1_i32_9 : i32
    %16 = tpu.assume_multiple %15, 1 : i32
    %c0_i32_10 = arith.constant 0 : i32
    %17 = tpu.memref_slice %arg0[%16, %c0_i32_10] : memref<1x2048xf32, #tpu.memory_space<any>> -> memref<1x2048xf32, #tpu.memory_space<any>>
    %c0_i32_11 = arith.constant 0 : i32
    %18 = tpu.memref_slice %arg1[%16, %c0_i32_11] : memref<1x2048xf32, #tpu.memory_space<any>> -> memref<1x2048xf32, #tpu.memory_space<any>>
    %19 = tpu.memref_slice %arg2[%14] : memref<1x!tpu.dma_semaphore, #tpu.memory_space<semaphore_mem>> -> memref<1x!tpu.dma_semaphore, #tpu.memory_space<semaphore_mem>>
    %20 = tpu.memref_squeeze %19 : memref<1x!tpu.dma_semaphore, #tpu.memory_space<semaphore_mem>> -> memref<!tpu.dma_semaphore, #tpu.memory_space<semaphore_mem>>
    tpu.wait_dma2 semaphore(%20 : memref<!tpu.dma_semaphore, #tpu.memory_space<semaphore_mem>>) src(%17 : memref<1x2048xf32, #tpu.memory_space<any>>) dst(%18 : memref<1x2048xf32, #tpu.memory_space<any>>)
    %c1_i32_12 = arith.constant 1 : i32
    %21 = arith.addi %c0_i32_3, %c1_i32_12 : i32
    %c1_i32_13 = arith.constant 1 : i32
    %22 = arith.cmpi slt, %21, %c1_i32_13 : i32
    %23 = arith.extui %22 : i1 to i32
    %c0_i32_14 = arith.constant 0 : i32
    %24 = arith.cmpi ne, %23, %c0_i32_14 : i32
    scf.if %24 {
      %c1_i32_16 = arith.constant 1 : i32
      %c0_i32_17 = arith.constant 0 : i32
      %25 = arith.cmpi eq, %c1_i32_16, %c0_i32_17 : i32
      %c1_i32_18 = arith.constant 1 : i32
      %26 = arith.select %25, %c1_i32_18, %c1_i32_16 : i32
      %27 = arith.remsi %21, %26 : i32
      %c0_i32_19 = arith.constant 0 : i32
      %28 = arith.cmpi ne, %27, %c0_i32_19 : i32
      %c0_i32_20 = arith.constant 0 : i32
      %29 = arith.cmpi slt, %27, %c0_i32_20 : i32
      %c0_i32_21 = arith.constant 0 : i32
      %30 = arith.cmpi slt, %26, %c0_i32_21 : i32
      %31 = arith.xori %29, %30 : i1
      %32 = arith.andi %31, %28 : i1
      %33 = arith.addi %27, %26 : i32
      %34 = arith.select %32, %33, %27 : i32
      %c1_i32_22 = arith.constant 1 : i32
      %35 = arith.muli %21, %c1_i32_22 : i32
      %36 = tpu.assume_multiple %35, 1 : i32
      %c0_i32_23 = arith.constant 0 : i32
      %37 = tpu.memref_slice %arg0[%36, %c0_i32_23] : memref<1x2048xf32, #tpu.memory_space<any>> -> memref<1x2048xf32, #tpu.memory_space<any>>
      %c0_i32_24 = arith.constant 0 : i32
      %38 = tpu.memref_slice %arg1[%36, %c0_i32_24] : memref<1x2048xf32, #tpu.memory_space<any>> -> memref<1x2048xf32, #tpu.memory_space<any>>
      %39 = tpu.memref_slice %arg2[%34] : memref<1x!tpu.dma_semaphore, #tpu.memory_space<semaphore_mem>> -> memref<1x!tpu.dma_semaphore, #tpu.memory_space<semaphore_mem>>
      %40 = tpu.memref_squeeze %39 : memref<1x!tpu.dma_semaphore, #tpu.memory_space<semaphore_mem>> -> memref<!tpu.dma_semaphore, #tpu.memory_space<semaphore_mem>>
      tpu.enqueue_dma source(%37 : memref<1x2048xf32, #tpu.memory_space<any>>) target(%38 : memref<1x2048xf32, #tpu.memory_space<any>>) target_semaphore(%40 : memref<!tpu.dma_semaphore, #tpu.memory_space<semaphore_mem>>)
    } else {
    }
    %c1_i32_15 = arith.constant 1 : i32
    return
  }
}

</mosaic_0001>

<bundles_post_ra>
// kernel: tpu_custom_call.1
= control target key start
LH: loop header
LB: loop body
LE: loop exit
PB: predicated region body
PF: predicated region fallthrough
CT: control target
= control target key end

     0   :  { %s35_s12 = smov [#allocation2]   ;;  %s36_s13 = smov [#allocation3]   ;;  %s54_s0 = inlined_call_operand.hbm [shape: f32[1,2048], index: 0, kind: input, shape index: {}]   ;;  %s55_s1 = inlined_call_operand.hbm [shape: f32[1,2048], index: 1, kind: output, shape index: {}]  }
   0x1   :  { %s13_s8 = sshll.u32 %s54_s0, 4  ;;  %s15_s11 = sshll.u32 %s55_s1, 4  ;;  %s14_s8 = int_to_ptr.hbm [resolvable:$true] %s13_s8  ;;  %s16_s11 = int_to_ptr.hbm [resolvable:$true] %s15_s11 }
   0x2   :  { %s37_s14 = smov 0  }
   0x3   :  { %19 = dma.general %s14_s8, 256, %s16_s11, %s35_s12, %s36_s13, [#allocation4], %s37_s14, 0  }
   0x4   :  { %33 = dma.done.wait [#allocation2], 256 }
   0x5   :  { %34 = vsyncadd [#allocation2], 4294967040 }
   0x6   :  { %23 = vsyncmov [#allocation2] }
   0x9   :  { %s24_s15 = vpop.sfrf %23 }
   0xa   :  { %p29_p0 = scmp.ne.s32.totalorder %s24_s15, 0 }
   0xc   :  { %28 = shalt.err (%p29_p0)  }

</bundles_post_ra>
